<compile_context>
chip_gen: v7x
topology: tpu7x:2x2x1
jax: 0.10.0
libtpu: 0.0.40
codegen_flags: <defaults>
</compile_context>

<pallas_src>
import jax
import jax.numpy as jnp
from jax.experimental import pallas as pl
from jax.experimental.pallas import tpu as pltpu

DIM = 64                    # flattened input dim (the "dim" ctor arg)
H1 = 400                    # fc1 / fc3 / fc4 hidden width (logical)
H1P = 512                   # H1 zero-padded to 4x128 lanes
LAT = 20                    # latent dim
BATCH = 16                  # sublane-aligned batch

ENC_PAD = 128               # lane-padded width of the wenc block inside w_out
W_OUT_W = ENC_PAD + DIM     # packed output-side weight width: 192
B4_OFF = 2 * H1P + ENC_PAD  # byte-free lane offsets inside the packed bias row
BIAS_W = B4_OFF + DIM       # 1216
OUT_W = 128                 # packed output slab: [recon(64)|mu(20)|logvar(20)|z(20)|pad(4)]


def vae_kernel(x_ref, eps_ref, w_in_ref, w_out_ref, bias_ref, out_ref):
    bf = jnp.bfloat16

    # Unpack the fused operands with static (free) ref slices.
    x = x_ref[...].astype(bf)                              # (B, 64)
    w1 = w_in_ref[0:DIM, :]                                # (64, 512) bf16
    w3 = w_in_ref[DIM:DIM + LAT, :]                        # (20, 512) bf16
    wenc = w_out_ref[:, 0:2 * LAT]                         # (512, 40) bf16
    w4 = w_out_ref[:, ENC_PAD:ENC_PAD + DIM]               # (512, 64) bf16
    b1 = bias_ref[:, 0:H1P]                                # (1, 512) f32
    b3 = bias_ref[:, H1P:2 * H1P]                          # (1, 512) f32
    benc = bias_ref[:, 2 * H1P:2 * H1P + 2 * LAT]          # (1, 40)  f32
    b4 = bias_ref[:, B4_OFF:B4_OFF + DIM]                  # (1, 64)  f32

    # ---- encode: fc1 + relu (bf16 operands -> MXU, f32 accumulate) ----
    h1 = jnp.dot(x, w1, preferred_element_type=jnp.float32) + b1
    h1 = jnp.maximum(h1, 0.0)

    # fused mu/logvar head: one (512, 40) matmul instead of two (400, 20)
    head = jnp.dot(h1.astype(bf), wenc,
                   preferred_element_type=jnp.float32) + benc
    mu = head[:, :LAT]
    logvar = head[:, LAT:]

    # ---- reparameterize (f32 elementwise; exp rides the EUP slot) ----
    std = jnp.exp(0.5 * logvar)
    z = mu + eps_ref[...] * std

    # ---- decode ----
    h3 = jnp.dot(z.astype(bf), w3, preferred_element_type=jnp.float32) + b3
    h3 = jnp.maximum(h3, 0.0)
    logits = jnp.dot(h3.astype(bf), w4, preferred_element_type=jnp.float32) + b4
    recon = jax.nn.sigmoid(logits)

    # Single lane-dense 128-wide store: [ recon | mu | logvar | z | pad ]
    pad = jnp.zeros((recon.shape[0], OUT_W - DIM - 3 * LAT), jnp.float32)
    out_ref[...] = jnp.concatenate([recon, head, z, pad], axis=1)


def prep_params(params):
    """One-time packing of the raw f32 params into the kernel's fused operands."""
    (w1, b1, w21, b21, w22, b22, w3, b3, w4, b4) = params
    bf = jnp.bfloat16

    def pad_cols(a, width):
        return jnp.pad(a, ((0, 0), (0, width - a.shape[1])))

    def pad_rows(a, height):
        return jnp.pad(a, ((0, height - a.shape[0]), (0, 0)))

    # Input-side weights (act @ W with W of shape (K, 512)), stacked row-wise.
    w_in = jnp.concatenate([pad_cols(w1, H1P),             # rows 0:64   -> fc1
                            pad_cols(w3, H1P)],            # rows 64:84  -> fc3
                           axis=0).astype(bf)              # (84, 512) bf16

    # Output-side weights (h @ W with W of shape (512, N)), packed lane-wise
    # at 128-lane offsets so in-kernel slices stay lane-tile aligned.
    wenc = jnp.concatenate([w21, w22], axis=1)             # (400, 40)
    wenc_p = pad_rows(pad_cols(wenc, ENC_PAD), H1P)        # (512, 128)
    w4_p = pad_rows(w4, H1P)                               # (512, 64)
    w_out = jnp.concatenate([wenc_p, w4_p], axis=1).astype(bf)   # (512, 192) bf16

    # All four biases in one f32 row (zero-padded lanes stay exactly zero).
    benc = jnp.concatenate([b21, b22], axis=1)             # (1, 40)
    biases = jnp.concatenate([pad_cols(b1, H1P),           # 0:512
                              pad_cols(b3, H1P),           # 512:1024
                              pad_cols(benc, ENC_PAD),     # 1024:1064 (pad to 1152)
                              b4],                         # 1152:1216
                             axis=1)                       # (1, 1216) f32
    return w_in, w_out, biases


@jax.jit
def vae_forward(x, eps, prepped):
    """x: (B, DIM) f32, eps: (B, LAT) f32. Returns (recon, mu, logvar, z), all f32."""
    w_in, w_out, biases = prepped
    B = x.shape[0]

    vspec = pl.BlockSpec(memory_space=pltpu.MemorySpace.VMEM)
    out = pl.pallas_call(
        vae_kernel,
        out_shape=jax.ShapeDtypeStruct((B, OUT_W), jnp.float32),
        in_specs=[vspec] * 5,
        out_specs=vspec,
    )(x, eps, w_in, w_out, biases)

    recon = out[:, :DIM]
    mu = out[:, DIM:DIM + LAT]
    logvar = out[:, DIM + LAT:DIM + 2 * LAT]
    z = out[:, DIM + 2 * LAT:DIM + 3 * LAT]
    return recon, mu, logvar, z


def init_linear(key, fan_in, fan_out):
    """PyTorch nn.Linear default init (uniform +-1/sqrt(fan_in)); weight stored (in, out)."""
    kw, kb = jax.random.split(key)
    bound = 1.0 / jnp.sqrt(fan_in)
    w = jax.random.uniform(kw, (fan_in, fan_out), jnp.float32, -bound, bound)
    b = jax.random.uniform(kb, (1, fan_out), jnp.float32, -bound, bound)
    return w, b


def init_params(key):
    k1, k21, k22, k3, k4 = jax.random.split(key, 5)
    w1, b1 = init_linear(k1, DIM, H1)
    w21, b21 = init_linear(k21, H1, LAT)
    w22, b22 = init_linear(k22, H1, LAT)
    w3, b3 = init_linear(k3, LAT, H1)
    w4, b4 = init_linear(k4, H1, DIM)
    return (w1, b1, w21, b21, w22, b22, w3, b3, w4, b4)


def vae_forward_ref(x, eps, params):
    """Pure-JAX reference with the same bf16-at-the-matmul / f32-accumulate math."""
    (w1, b1, w21, b21, w22, b22, w3, b3, w4, b4) = params
    bf = jnp.bfloat16

    def mm(a, w):
        return jnp.dot(a.astype(bf), w.astype(bf), preferred_element_type=jnp.float32)

    h1 = jax.nn.relu(mm(x, w1) + b1)
    mu = mm(h1, w21) + b21
    logvar = mm(h1, w22) + b22
    std = jnp.exp(0.5 * logvar)
    z = mu + eps * std
    h3 = jax.nn.relu(mm(z, w3) + b3)
    recon = jax.nn.sigmoid(mm(h3, w4) + b4)
    return recon, mu, logvar, z


if __name__ == "__main__":
    key = jax.random.PRNGKey(0)
    kx, keps, kp = jax.random.split(key, 3)

    # Input shaped like an image batch; forward flattens via view(-1, dim).
    x_img = jax.random.normal(kx, (BATCH, 1, 8, 8), jnp.float32)   # 1*8*8 == DIM
    x = x_img.reshape(-1, DIM)
    # TODO(synk): torch.randn_like noise is sampled host-side (fixed key) and
    # passed in so the kernel stays deterministic.
    eps = jax.random.normal(keps, (x.shape[0], LAT), jnp.float32)

    params = init_params(kp)
    prepped = jax.block_until_ready(prep_params(params))   # one-time prep, off the hot path

    recon, mu, logvar, z = jax.block_until_ready(vae_forward(x, eps, prepped))
    recon_r, mu_r, logvar_r, z_r = vae_forward_ref(x, eps, params)

    # bf16 operands at the MXU -> compare against the matching bf16 reference
    # with a tolerance covering accumulation-order / 1-ulp bf16 rounding diffs.
    TOL = dict(atol=1e-2, rtol=1e-2)
    assert jnp.allclose(recon, recon_r, **TOL)
    assert jnp.allclose(mu, mu_r, **TOL)
    assert jnp.allclose(logvar, logvar_r, **TOL)
    assert jnp.allclose(z, z_r, **TOL)

    print("KERNEL_OK")
</pallas_src>

<mosaic_0001>
module attributes {stable_mosaic.version = 11 : i64} {
  func.func @vae_kernel(%arg0: memref<16x64xf32, #tpu.memory_space<vmem>>, %arg1: memref<16x20xf32, #tpu.memory_space<vmem>>, %arg2: memref<84x512xbf16, #tpu.memory_space<vmem>>, %arg3: memref<512x192xbf16, #tpu.memory_space<vmem>>, %arg4: memref<1x1216xf32, #tpu.memory_space<vmem>>, %arg5: memref<16x128xf32, #tpu.memory_space<vmem>>) attributes {dimension_semantics = [], scalar_prefetch = 0 : i64, scratch_operands = 0 : i64, tpu.core_type = #tpu.core_type<tc>} {
    %c0 = arith.constant 0 : index
    %c0_0 = arith.constant 0 : index
    %0 = vector.load %arg0[%c0, %c0_0] : memref<16x64xf32, #tpu.memory_space<vmem>>, vector<16x64xf32>
    %1 = arith.truncf %0 : vector<16x64xf32> to vector<16x64xbf16>
    %c0_1 = arith.constant 0 : index
    %c0_2 = arith.constant 0 : index
    %2 = vector.load %arg2[%c0_1, %c0_2] : memref<84x512xbf16, #tpu.memory_space<vmem>>, vector<64x512xbf16>
    %c64 = arith.constant 64 : index
    %c0_3 = arith.constant 0 : index
    %3 = vector.load %arg2[%c64, %c0_3] : memref<84x512xbf16, #tpu.memory_space<vmem>>, vector<20x512xbf16>
    %c0_4 = arith.constant 0 : index
    %c0_5 = arith.constant 0 : index
    %4 = vector.load %arg3[%c0_4, %c0_5] : memref<512x192xbf16, #tpu.memory_space<vmem>>, vector<512x40xbf16>
    %c0_6 = arith.constant 0 : index
    %c128 = arith.constant 128 : index
    %5 = vector.load %arg3[%c0_6, %c128] : memref<512x192xbf16, #tpu.memory_space<vmem>>, vector<512x64xbf16>
    %c0_7 = arith.constant 0 : index
    %c0_8 = arith.constant 0 : index
    %6 = vector.load %arg4[%c0_7, %c0_8] : memref<1x1216xf32, #tpu.memory_space<vmem>>, vector<1x512xf32>
    %c0_9 = arith.constant 0 : index
    %c512 = arith.constant 512 : index
    %7 = vector.load %arg4[%c0_9, %c512] : memref<1x1216xf32, #tpu.memory_space<vmem>>, vector<1x512xf32>
    %c0_10 = arith.constant 0 : index
    %c1024 = arith.constant 1024 : index
    %8 = vector.load %arg4[%c0_10, %c1024] : memref<1x1216xf32, #tpu.memory_space<vmem>>, vector<1x40xf32>
    %c0_11 = arith.constant 0 : index
    %c1152 = arith.constant 1152 : index
    %9 = vector.load %arg4[%c0_11, %c1152] : memref<1x1216xf32, #tpu.memory_space<vmem>>, vector<1x64xf32>
    %cst = arith.constant dense<0.000000e+00> : vector<16x512xf32>
    %10 = tpu.matmul %1, %2, %cst {dimension_numbers = #tpu.dot_dimension_numbers<[1], [0], [0], [1], [0, 0, 1, 1], [], []>} : vector<16x64xbf16>, vector<64x512xbf16>, vector<16x512xf32> -> vector<16x512xf32>
    %11 = vector.broadcast %6 : vector<1x512xf32> to vector<16x512xf32>
    %12 = arith.addf %10, %11 : vector<16x512xf32>
    %cst_12 = arith.constant 0.000000e+00 : f32
    %13 = vector.broadcast %cst_12 : f32 to vector<16x512xf32>
    %14 = arith.maximumf %12, %13 : vector<16x512xf32>
    %15 = arith.truncf %14 : vector<16x512xf32> to vector<16x512xbf16>
    %cst_13 = arith.constant dense<0.000000e+00> : vector<16x40xf32>
    %16 = tpu.matmul %15, %4, %cst_13 {dimension_numbers = #tpu.dot_dimension_numbers<[1], [0], [0], [1], [0, 0, 1, 1], [], []>} : vector<16x512xbf16>, vector<512x40xbf16>, vector<16x40xf32> -> vector<16x40xf32>
    %17 = vector.broadcast %8 : vector<1x40xf32> to vector<16x40xf32>
    %18 = arith.addf %16, %17 : vector<16x40xf32>
    %19 = vector.extract_strided_slice %18 {offsets = [0, 0], sizes = [16, 20], strides = [1, 1]} : vector<16x40xf32> to vector<16x20xf32>
    %20 = vector.extract_strided_slice %18 {offsets = [0, 20], sizes = [16, 20], strides = [1, 1]} : vector<16x40xf32> to vector<16x20xf32>
    %cst_14 = arith.constant 5.000000e-01 : f32
    %21 = vector.broadcast %cst_14 : f32 to vector<16x20xf32>
    %22 = arith.mulf %21, %20 : vector<16x20xf32>
    %23 = math.exp %22 : vector<16x20xf32>
    %c0_15 = arith.constant 0 : index
    %c0_16 = arith.constant 0 : index
    %24 = vector.load %arg1[%c0_15, %c0_16] : memref<16x20xf32, #tpu.memory_space<vmem>>, vector<16x20xf32>
    %25 = arith.mulf %24, %23 : vector<16x20xf32>
    %26 = arith.addf %19, %25 : vector<16x20xf32>
    %27 = arith.truncf %26 : vector<16x20xf32> to vector<16x20xbf16>
    %cst_17 = arith.constant dense<0.000000e+00> : vector<16x512xf32>
    %28 = tpu.matmul %27, %3, %cst_17 {dimension_numbers = #tpu.dot_dimension_numbers<[1], [0], [0], [1], [0, 0, 1, 1], [], []>} : vector<16x20xbf16>, vector<20x512xbf16>, vector<16x512xf32> -> vector<16x512xf32>
    %29 = vector.broadcast %7 : vector<1x512xf32> to vector<16x512xf32>
    %30 = arith.addf %28, %29 : vector<16x512xf32>
    %cst_18 = arith.constant 0.000000e+00 : f32
    %31 = vector.broadcast %cst_18 : f32 to vector<16x512xf32>
    %32 = arith.maximumf %30, %31 : vector<16x512xf32>
    %33 = arith.truncf %32 : vector<16x512xf32> to vector<16x512xbf16>
    %cst_19 = arith.constant dense<0.000000e+00> : vector<16x64xf32>
    %34 = tpu.matmul %33, %5, %cst_19 {dimension_numbers = #tpu.dot_dimension_numbers<[1], [0], [0], [1], [0, 0, 1, 1], [], []>} : vector<16x512xbf16>, vector<512x64xbf16>, vector<16x64xf32> -> vector<16x64xf32>
    %35 = vector.broadcast %9 : vector<1x64xf32> to vector<16x64xf32>
    %36 = arith.addf %34, %35 : vector<16x64xf32>
    %37 = arith.negf %36 : vector<16x64xf32>
    %38 = math.exp %37 : vector<16x64xf32>
    %cst_20 = arith.constant 1.000000e+00 : f32
    %39 = vector.broadcast %cst_20 : f32 to vector<16x64xf32>
    %40 = arith.addf %39, %38 : vector<16x64xf32>
    %41 = arith.divf %39, %40 : vector<16x64xf32>
    %cst_21 = arith.constant 0.000000e+00 : f32
    %42 = vector.broadcast %cst_21 : f32 to vector<16x4xf32>
    %43 = tpu.concatenate %41, %18, %26, %42 in 1 : vector<16x64xf32>, vector<16x40xf32>, vector<16x20xf32>, vector<16x4xf32> -> vector<16x128xf32>
    %c0_22 = arith.constant 0 : index
    %c0_23 = arith.constant 0 : index
    %44 = vector.load %arg5[%c0_22, %c0_23] : memref<16x128xf32, #tpu.memory_space<vmem>>, vector<16x128xf32>
    tpu.vector_store %arg5[%c0_22, %c0_23], %43 {strides = array<i32>} : memref<16x128xf32, #tpu.memory_space<vmem>>, vector<16x128xf32>,
    return
  }
}

</mosaic_0001>

<bundles_post_ra>
// kernel: vae_forward.1
= control target key start
LH: loop header
LB: loop body
LE: loop exit
PB: predicated region body
PF: predicated region fallthrough
CT: control target
= control target key end

     0   :  { %v1470_v1 = vmov 0   ;;  %vm279_vm0 = vcmask 523264   ;;  %v179_v52 = vlaneseq  ;;  %s1471_s19 = smov 64   ;;  %vm737_vm1 = vcmask 1041408   ;;  %s1472_s7 = smov 108   ;;  %s1822_s2 = inlined_call_operand.vmem [shape: bf16[84,512], index: 2, kind: input, shape index: {}]   ;;  %s1823_s0 = inlined_call_operand.vmem [shape: f32[16,64], index: 0, kind: input, shape index: {}]   ;;  %s1824_s3 = inlined_call_operand.vmem [shape: bf16[512,192], index: 3, kind: input, shape index: {}]   ;;  %s1825_s4 = inlined_call_operand.vmem [shape: f32[1,1216], index: 4, kind: input, shape index: {}]   ;;  %s1826_s1 = inlined_call_operand.vmem [shape: f32[16,20], index: 1, kind: input, shape index: {}]   ;;  %s1827_s5 = inlined_call_operand.vmem [shape: f32[16,128], index: 5, kind: output, shape index: {}]  }
   0x1   :  { %v1360_v0 = vld [vmem:[%s1822_s2 + $0x4] ss:$16 sps:$4 sm:$0xff]   ;;  %315 = vmatprep.mubr.bf16.mxu0 %v1470_v1  ;;  %358 = vmatprep.mubr.bf16.mxu1 %v1470_v1  ;;  %v1362_v2 = vld [vmem:[%s1822_s2 + $0xc] ss:$16 sps:$4 sm:$0xff]   ;;  %v1364_v3 = vld [vmem:[%s1822_s2] ss:$16 sps:$4 sm:$0xff]  }
   0x2   :  { %283 = vmatprep.subr.bf16.mxu0 %v1360_v0  ;;  %v1365_v4 = vld [vmem:[%s1822_s2 + $0x8] ss:$16 sps:$4 sm:$0xff]   ;;  %326 = vmatprep.subr.bf16.mxu1 %v1362_v2  ;;  %v1366_v5 = vld [vmem:[%s1822_s2 + $0x24] ss:$16 sps:$4 sm:$0xff]   ;;  %v1368_v6 = vld [vmem:[%s1822_s2 + $0x2c] ss:$16 sps:$4 sm:$0xff]  }
   0x3   :  { %284 = vmatpush1.bf16.msra.mxu0 %v1364_v3  ;;  %327 = vmatpush1.bf16.msra.mxu1 %v1365_v4  ;;  %v1370_v7 = vld [vmem:[%s1822_s2 + $0x20] ss:$16 sps:$4 sm:$0xff]   ;;  %v1371_v8 = vld [vmem:[%s1822_s2 + $0x28] ss:$16 sps:$4 sm:$0xff]   ;;  %v1372_v9 = vld [vmem:[%s1822_s2 + $0x44] ss:$16 sps:$4 sm:$0xff]  }
   0x4   :  { %285 = vmatprep.subr.bf16.mxu0 %v1366_v5  ;;  %328 = vmatprep.subr.bf16.mxu1 %v1368_v6  ;;  %v1374_v10 = vld [vmem:[%s1822_s2 + $0x4c] ss:$16 sps:$4 sm:$0xff]   ;;  %v1376_v11 = vld [vmem:[%s1822_s2 + $0x40] ss:$16 sps:$4 sm:$0xff]   ;;  %v1377_v12 = vld [vmem:[%s1822_s2 + $0x48] ss:$16 sps:$4 sm:$0xff]  }
   0x5   :  { %v1378_v13 = vld [vmem:[%s1822_s2 + $0x64] ss:$16 sps:$4 sm:$0xff]   ;;  %v1380_v14 = vld [vmem:[%s1822_s2 + $0x6c] ss:$16 sps:$4 sm:$0xff]   ;;  %v1382_v15 = vld [vmem:[%s1822_s2 + $0x60] ss:$16 sps:$4 sm:$0xff]  }
   0x6   :  { %v1383_v16 = vld [vmem:[%s1822_s2 + $0x68] ss:$16 sps:$4 sm:$0xff]   ;;  %v21_v17 = vld [vmem:[%s1823_s0] sm:$0xff]  ;;  %v1658_v53 = vshrl.u32 %v179_v52, 7  ;;  %s1473_s14 = smov 104   ;;  %vm733_vm2 = vcmask 162816  }
   0x7   :  { %286 = vmatpush1.bf16.msra.mxu0 %v1370_v7  ;;  %329 = vmatpush1.bf16.msra.mxu1 %v1371_v8  ;;  %v22_v18 = vld [vmem:[%s1823_s0 + $0x8] sm:$0xff]  ;;  %v1388_v24 = vld [vmem:[%s1824_s3 + $0x90] ss:$8 sps:$4 sm:$0xff]   ;;  %v174_v56 = vld [vmem:[%s1825_s4] sm:$0xf]  ;;  %vm1158_vm3 = vcmask 850944  }
   0x8   :  { %287 = vmatprep.subr.bf16.mxu0 %v1372_v9  ;;  %330 = vmatprep.subr.bf16.mxu1 %v1374_v10  ;;  %v1384_v19 = vld [vmem:[%s1824_s3 + $0x80] ss:$8 sps:$4 sm:$0xff]   ;;  %v23_v22 = vpack.c.bf16 %v22_v18, %v21_v17  ;;  %v1389_v25 = vld [vmem:[%s1824_s3 + $0x190] ss:$8 sps:$4 sm:$0xff]   ;;  %v181_v54 = vsub.s32 0, %v1658_v53  ;;  %v189_v55 = vsub.s32 2, %v1658_v53 }
   0x9   :  { %v1385_v20 = vld [vmem:[%s1824_s3 + $0x180] ss:$8 sps:$4 sm:$0xff]   ;;  %v1390_v26 = vld [vmem:[%s1824_s3 + $0x10] ss:$8 sps:$4 sm:$0xff]   ;;  %v185_v57 = vsub.s32 1, %v1658_v53  ;;  %v193_v58 = vsub.s32 3, %v1658_v53 }
   0xa   :  { %v1386_v21 = vld [vmem:[%s1824_s3] ss:$8 sps:$4 sm:$0xff]   ;;  %v1391_v27 = vld [vmem:[%s1824_s3 + $0x110] ss:$8 sps:$4 sm:$0xff]   ;;  %v182_v59 = vrot.slane %v174_v56, %v181_v54  ;;  %v190_v60 = vrot.slane %v174_v56, %v189_v55  ;;  %vm1161_vm4 = vcmask 1014784  }
   0xb   :  { %288 = vmatpush1.bf16.msra.mxu0 %v1376_v11  ;;  %331 = vmatpush1.bf16.msra.mxu1 %v1377_v12  ;;  %v1387_v23 = vld [vmem:[%s1824_s3 + $0x100] ss:$8 sps:$4 sm:$0xff]   ;;  %v1396_v32 = vld [vmem:[%s1824_s3 + $0xb0] ss:$8 sps:$4 sm:$0xff]   ;;  %v186_v61 = vrot.slane %v174_v56, %v185_v57  ;;  %v194_v62 = vrot.slane %v174_v56, %v193_v58 }
   0xc   :  { %289 = vmatprep.subr.bf16.mxu0 %v1378_v13  ;;  %332 = vmatprep.subr.bf16.mxu1 %v1380_v14  ;;  %v1392_v28 = vld [vmem:[%s1824_s3 + $0xa0] ss:$8 sps:$4 sm:$0xff]   ;;  %v1397_v33 = vld [vmem:[%s1824_s3 + $0x1b0] ss:$8 sps:$4 sm:$0xff]  }
   0xd   :  { %v1393_v29 = vld [vmem:[%s1824_s3 + $0x1a0] ss:$8 sps:$4 sm:$0xff]   ;;  %v1398_v34 = vld [vmem:[%s1824_s3 + $0x30] ss:$8 sps:$4 sm:$0xff]  }
   0xe   :  { %v1394_v30 = vld [vmem:[%s1824_s3 + $0x20] ss:$8 sps:$4 sm:$0xff]   ;;  %v1399_v35 = vld [vmem:[%s1824_s3 + $0x130] ss:$8 sps:$4 sm:$0xff]  }
   0xf   :  { %290 = vmatpush1.bf16.msra.mxu0 %v1382_v15  ;;  %333 = vmatpush1.bf16.msra.mxu1 %v1383_v16  ;;  %v1395_v31 = vld [vmem:[%s1824_s3 + $0x120] ss:$8 sps:$4 sm:$0xff]   ;;  %v1404_v40 = vld [vmem:[%s1824_s3 + $0xd0] ss:$8 sps:$4 sm:$0xff]  }
  0x10   :  { %1268 = vmatprep.subr.bf16.mxu0 %v1384_v19  ;;  %1290 = vmatprep.subr.bf16.mxu1 %v1385_v20  ;;  %v1400_v36 = vld [vmem:[%s1824_s3 + $0xc0] ss:$8 sps:$4 sm:$0xff]   ;;  %v1405_v41 = vld [vmem:[%s1824_s3 + $0x1d0] ss:$8 sps:$4 sm:$0xff]  }
  0x11   :  { %v1401_v37 = vld [vmem:[%s1824_s3 + $0x1c0] ss:$8 sps:$4 sm:$0xff]   ;;  %v1406_v42 = vld [vmem:[%s1824_s3 + $0x50] ss:$8 sps:$4 sm:$0xff]  }
  0x12   :  { %1186 = vmatmul.mubr.msk.bf16.vlgmr.msra.gmra.mrb[0].mxu0 %vm279_vm0, %v23_v22  ;;  %1187 = vmatmul.mubr.msk.bf16.vlgmr.msra.gmra.mrb[0].mxu1 %vm279_vm0, %v23_v22  ;;  %v1402_v38 = vld [vmem:[%s1824_s3 + $0x40] ss:$8 sps:$4 sm:$0xff]   ;;  %v1407_v43 = vld [vmem:[%s1824_s3 + $0x150] ss:$8 sps:$4 sm:$0xff]  }
  0x13   :  { %1269 = vmatpush3.bf16.msra.mxu0 %v1386_v21  ;;  %1291 = vmatpush3.bf16.msra.mxu1 %v1387_v23  ;;  %v1403_v39 = vld [vmem:[%s1824_s3 + $0x140] ss:$8 sps:$4 sm:$0xff]   ;;  %v1412_v48 = vld [vmem:[%s1824_s3 + $0xf0] ss:$8 sps:$4 sm:$0xff]  }
  0x14   :  { %1270 = vmatprep.subr.bf16.mxu0 %v1388_v24  ;;  %1292 = vmatprep.subr.bf16.mxu1 %v1389_v25  ;;  %v1408_v44 = vld [vmem:[%s1824_s3 + $0xe0] ss:$8 sps:$4 sm:$0xff]   ;;  %v1413_v49 = vld [vmem:[%s1824_s3 + $0x1f0] ss:$8 sps:$4 sm:$0xff]  }
  0x15   :  { %v1409_v45 = vld [vmem:[%s1824_s3 + $0x1e0] ss:$8 sps:$4 sm:$0xff]   ;;  %v1414_v50 = vld [vmem:[%s1824_s3 + $0x70] ss:$8 sps:$4 sm:$0xff]  }
  0x16   :  { %v1410_v46 = vld [vmem:[%s1824_s3 + $0x60] ss:$8 sps:$4 sm:$0xff]   ;;  %v1415_v51 = vld [vmem:[%s1824_s3 + $0x170] ss:$8 sps:$4 sm:$0xff]  }
  0x17   :  { %1271 = vmatpush3.bf16.msra.mxu0 %v1390_v26  ;;  %1293 = vmatpush3.bf16.msra.mxu1 %v1391_v27  ;;  %v1411_v47 = vld [vmem:[%s1824_s3 + $0x160] ss:$8 sps:$4 sm:$0xff]  }
  0x18   :  { %1272 = vmatprep.subr.bf16.mxu0 %v1392_v28  ;;  %1294 = vmatprep.subr.bf16.mxu1 %v1393_v29  ;;  %v44_v52 = vld [vmem:[%s1822_s2 + $0xa0] sm:$0x33]  ;;  %v45_v56 = vld [vmem:[%s1822_s2 + $0xa8] sm:$0x33] }
  0x1b   :  { %1273 = vmatpush3.bf16.msra.mxu0 %v1394_v30  ;;  %1295 = vmatpush3.bf16.msra.mxu1 %v1395_v31  ;;  %v1188_v30 = vld [vmem:[%s1825_s4 + $0x8] ss:$0 sm:$0xff] }
  0x1c   :  { %1274 = vmatprep.subr.bf16.mxu0 %v1396_v32  ;;  %1296 = vmatprep.subr.bf16.mxu1 %v1397_v33 }
  0x1f   :  { %1275 = vmatpush3.bf16.msra.mxu0 %v1398_v34  ;;  %1297 = vmatpush3.bf16.msra.mxu1 %v1399_v35 }
  0x20   :  { %1276 = vmatprep.subr.bf16.mxu0 %v1400_v36  ;;  %1298 = vmatprep.subr.bf16.mxu1 %v1401_v37 }
  0x23   :  { %1277 = vmatpush3.bf16.msra.mxu0 %v1402_v38  ;;  %1299 = vmatpush3.bf16.msra.mxu1 %v1403_v39 }
  0x24   :  { %1278 = vmatprep.subr.bf16.mxu0 %v1404_v40  ;;  %1300 = vmatprep.subr.bf16.mxu1 %v1405_v41 }
  0x27   :  { %1279 = vmatpush3.bf16.msra.mxu0 %v1406_v42  ;;  %1301 = vmatpush3.bf16.msra.mxu1 %v1407_v43 }
  0x28   :  { %1280 = vmatprep.subr.bf16.mxu0 %v1408_v44  ;;  %1302 = vmatprep.subr.bf16.mxu1 %v1409_v45 }
  0x2b   :  { %1281 = vmatpush3.bf16.msra.mxu0 %v1410_v46  ;;  %1303 = vmatpush3.bf16.msra.mxu1 %v1411_v47  ;;  %v1418_v47 = vld [vmem:[%s1822_s2 + $0x84] ss:$16 sps:$4 sm:$0xff]  }
  0x2c   :  { %1282 = vmatprep.subr.bf16.mxu0 %v1412_v48  ;;  %1304 = vmatprep.subr.bf16.mxu1 %v1413_v49  ;;  %v1416_v48 = vld [vmem:[%s1822_s2 + $0x80] ss:$16 sps:$4 sm:$0xff]   ;;  %v1419_v49 = vld [vmem:[%s1822_s2 + $0x88] ss:$16 sps:$4 sm:$0xff]  }
  0x2f   :  { %1283 = vmatpush3.bf16.msra.mxu0 %v1414_v50  ;;  %1305 = vmatpush3.bf16.msra.mxu1 %v1415_v51  ;;  %v1421_v50 = vld [vmem:[%s1822_s2 + $0x8c] ss:$16 sps:$4 sm:$0xff]  }
  0x30   :  { %750 = vmatprep.subr.bf16.mxu0 %v1418_v47  ;;  %793 = vmatprep.subr.bf16.mxu1 %v1421_v50 }
  0xe5   :  { %v317_v63 = vpop.f32.mrb[0].mxu0  ;;  %v360_v0 = vpop.f32.mrb[0].mxu1 }
  0xe6   :  { %v318_v2 = vadd.f32 %v317_v63, %v182_v59  ;;  %v361_v3 = vadd.f32 %v360_v0, %v190_v60  ;;  %v319_v4 = vpop.f32.mrb[1].mxu0  ;;  %v362_v5 = vpop.f32.mrb[1].mxu1 }
  0xe7   :  { %v320_v6 = vadd.f32 %v319_v4, %v186_v61  ;;  %v363_v7 = vadd.f32 %v362_v5, %v194_v62  ;;  %v321_v8 = vpop.f32.mrb[2].mxu0  ;;  %v364_v9 = vpop.f32.mrb[2].mxu1  ;;  %v1426_v4 = vld [vmem:[%s1824_s3 + $0x84] ss:$8 sps:$4 sm:$0xff]  }
  0xe8   :  { %v371_v10 = vmax.f32 %v361_v3, 0.0  ;;  %v322_v11 = vadd.f32 %v321_v8, %v182_v59  ;;  %v365_v12 = vadd.f32 %v364_v9, %v190_v60  ;;  %v323_v13 = vpop.f32.mrb[3].mxu0  ;;  %v366_v14 = vpop.f32.mrb[3].mxu1  ;;  %v369_v18 = vmax.f32 %v318_v2, 0.0  ;;  %v1427_v5 = vld [vmem:[%s1824_s3 + $0x184] ss:$8 sps:$4 sm:$0xff]  }
  0xe9   :  { %v372_v15 = vmax.f32 %v363_v7, 0.0  ;;  %v324_v16 = vadd.f32 %v323_v13, %v186_v61  ;;  %v367_v17 = vadd.f32 %v366_v14, %v194_v62  ;;  %v370_v21 = vmax.f32 %v320_v6, 0.0  ;;  %v667_v6 = vld [vmem:[%s1826_s1] sm:$0xff]  ;;  %v668_v9 = vld [vmem:[%s1826_s1 + $0x8] sm:$0xff] }
  0xea   :  { %v373_v19 = vmax.f32 %v322_v11, 0.0  ;;  %v375_v20 = vmax.f32 %v365_v12, 0.0  ;;  %v1226_v59 = vcombine.high %v44_v52, %v44_v52  ;;  %v1225_v60 = vcombine.low %v44_v52, %v44_v52  ;;  %v1428_v14 = vld [vmem:[%s1824_s3 + $0x4] ss:$8 sps:$4 sm:$0xff]  }
  0xeb   :  { %v374_v22 = vmax.f32 %v324_v16, 0.0  ;;  %v376_v23 = vmax.f32 %v367_v17, 0.0  ;;  %v1228_v61 = vcombine.high %v45_v56, %v45_v56  ;;  %v1227_v62 = vcombine.low %v45_v56, %v45_v56  ;;  %v1430_v17 = vld [vmem:[%s1824_s3 + $0x94] ss:$8 sps:$4 sm:$0xff]  }
  0xec   :  { %v377_v24 = vpack.c.bf16 %v373_v19, %v369_v18  ;;  %v379_v25 = vpack.c.bf16 %v375_v20, %v371_v10  ;;  %v739_v63 = vsel %vm737_vm1, %v1225_v60, 0  ;;  %v1431_v18 = vld [vmem:[%s1824_s3 + $0x194] ss:$8 sps:$4 sm:$0xff]  }
  0xed   :  { %v378_v26 = vpack.c.bf16 %v374_v22, %v370_v21  ;;  %v380_v27 = vpack.c.bf16 %v376_v23, %v372_v15  ;;  %v745_v0 = vsel %vm737_vm1, %v1227_v62, 0  ;;  %v1429_v15 = vld [vmem:[%s1824_s3 + $0x104] ss:$8 sps:$4 sm:$0xff]   ;;  %v1432_v19 = vld [vmem:[%s1824_s3 + $0x14] ss:$8 sps:$4 sm:$0xff]  }
  0xee   :  { %v1433_v20 = vld [vmem:[%s1824_s3 + $0x114] ss:$8 sps:$4 sm:$0xff]   ;;  %v1434_v21 = vld [vmem:[%s1824_s3 + $0xa4] ss:$8 sps:$4 sm:$0xff]  }
  0xef   :  { %611 = vmatprep.mubr.bf16.mxu0 %v378_v26  ;;  %652 = vmatprep.mubr.bf16.mxu1 %v380_v27  ;;  %v1435_v22 = vld [vmem:[%s1824_s3 + $0x1a4] ss:$8 sps:$4 sm:$0xff]   ;;  %v1439_v26 = vld [vmem:[%s1824_s3 + $0x1b4] ss:$8 sps:$4 sm:$0xff]  }
  0xf0   :  { %612 = vmatmul.mubr.bf16.vlgmr.msra.gmra.mrb[4].mxu0 %v377_v24  ;;  %653 = vmatmul.mubr.bf16.vlgmr.msra.gmra.mrb[4].mxu1 %v379_v25  ;;  %v1436_v23 = vld [vmem:[%s1824_s3 + $0x24] ss:$8 sps:$4 sm:$0xff]   ;;  %v1438_v25 = vld [vmem:[%s1824_s3 + $0xb4] ss:$8 sps:$4 sm:$0xff]  }
  0xf1   :  { %782 = vmatprep.mubr.bf16.mxu0 %v1470_v1  ;;  %825 = vmatprep.mubr.bf16.mxu1 %v1470_v1  ;;  %v1437_v24 = vld [vmem:[%s1824_s3 + $0x124] ss:$8 sps:$4 sm:$0xff]   ;;  %v1440_v27 = vld [vmem:[%s1824_s3 + $0x34] ss:$8 sps:$4 sm:$0xff]  }
  0xf2   :  { %751 = vmatpush1.bf16.msra.mxu0 %v1416_v48  ;;  %794 = vmatpush1.bf16.msra.mxu1 %v1419_v49 }
  0xf3   :  { %1229 = vmatprep.subr.msk.bf16.mxu0 %vm737_vm1, %v1226_v59  ;;  %1231 = vmatprep.subr.msk.bf16.mxu1 %vm737_vm1, %v1228_v61 }
  0xf6   :  { %753 = vmatpush1.bf16.msra.mxu0 %v739_v63  ;;  %796 = vmatpush1.bf16.msra.mxu1 %v745_v0 }
  0xf7   :  { %1312 = vmatprep.subr.bf16.mxu0 %v1426_v4  ;;  %1334 = vmatprep.subr.bf16.mxu1 %v1427_v5 }
 0x1c3   :  { %v1284_v28 = vpop.f32.mrb[4].mxu0  ;;  %v1306_v29 = vpop.f32.mrb[4].mxu1 }
 0x1c4   :  { %v1285_v31 = vpop.f32.mrb[5].mxu0  ;;  %v1307_v32 = vpop.f32.mrb[5].mxu1 }
 0x1c5   :  { %v1286_v33 = vadd.f32 %v1285_v31, %v1284_v28  ;;  %v1308_v34 = vadd.f32 %v1307_v32, %v1306_v29  ;;  %v1287_v35 = vpop.f32.mrb[6].mxu0  ;;  %v1309_v36 = vpop.f32.mrb[6].mxu1  ;;  %v1441_v28 = vld [vmem:[%s1824_s3 + $0x134] ss:$8 sps:$4 sm:$0xff]   ;;  %v1442_v29 = vld [vmem:[%s1824_s3 + $0xc4] ss:$8 sps:$4 sm:$0xff]  }
 0x1c6   :  { %v1288_v37 = vpop.f32.mrb[7].mxu0  ;;  %v1310_v38 = vpop.f32.mrb[7].mxu1  ;;  %v1444_v31 = vld [vmem:[%s1824_s3 + $0x44] ss:$8 sps:$4 sm:$0xff]  }
 0x1c7   :  { %v614_v39 = vadd.f32 %v1286_v33, %v1188_v30  ;;  %v1289_v40 = vadd.f32 %v1288_v37, %v1287_v35  ;;  %v1311_v41 = vadd.f32 %v1310_v38, %v1309_v36  ;;  %v1445_v32 = vld [vmem:[%s1824_s3 + $0x144] ss:$8 sps:$4 sm:$0xff]   ;;  %v1446_v33 = vld [vmem:[%s1824_s3 + $0xd4] ss:$8 sps:$4 sm:$0xff]  }
 0x1c8   :  { %v1448_v35 = vld [vmem:[%s1824_s3 + $0x54] ss:$8 sps:$4 sm:$0xff]   ;;  %v1450_v37 = vld [vmem:[%s1824_s3 + $0xe4] ss:$8 sps:$4 sm:$0xff]  }
 0x1c9   :  { %v655_v42 = vadd.f32 %v1308_v34, %v614_v39  ;;  %v617_v43 = vadd.f32 %v1289_v40, %v1188_v30  ;;  %v1443_v30 = vld [vmem:[%s1824_s3 + $0x1c4] ss:$8 sps:$4 sm:$0xff]   ;;  %v1447_v34 = vld [vmem:[%s1824_s3 + $0x1d4] ss:$8 sps:$4 sm:$0xff]  }
 0x1ca   :  { %v1449_v36 = vld [vmem:[%s1824_s3 + $0x154] ss:$8 sps:$4 sm:$0xff]   ;;  %v1451_v38 = vld [vmem:[%s1824_s3 + $0x1e4] ss:$8 sps:$4 sm:$0xff]  }
 0x1cb   :  { %v661_v1 = vmul.f32 0.5, %v655_v42  ;;  %v658_v44 = vadd.f32 %v1311_v41, %v617_v43  ;;  %1142 = vrot.lane.b32.xlu1 %v655_v42, %s1471_s19  ;;  %v1452_v39 = vld [vmem:[%s1824_s3 + $0x64] ss:$8 sps:$4 sm:$0xff]   ;;  %v1454_v41 = vld [vmem:[%s1824_s3 + $0xf4] ss:$8 sps:$4 sm:$0xff]  }
 0x1cc   :  { %v1453_v40 = vld [vmem:[%s1824_s3 + $0x164] ss:$8 sps:$4 sm:$0xff]   ;;  %v1456_v43 = vld [vmem:[%s1824_s3 + $0x74] ss:$8 sps:$4 sm:$0xff]  }
 0x1cd   :  { %v663_v45 = vmul.f32 1.442695, %v661_v1  ;;  %v662_v46 = vmul.f32 0.5, %v658_v44  ;;  %v1457_v1 = vld [vmem:[%s1824_s3 + $0x174] ss:$8 sps:$4 sm:$0xff]  }
 0x1cf   :  { %1458 = vpow2.f32 %v663_v45  ;;  %v665_v51 = vmul.f32 1.442695, %v662_v46  ;;  %1144 = vrot.lane.b32.xlu1 %v658_v44, %s1471_s19 }
 0x1d1   :  { %1460 = vpow2.f32 %v665_v51 }
 0x1d9   :  { %v1459_v2 = vpop.eup %1458 }
 0x1da   :  { %671 = vrot.lane.b32.xlu0 %v1459_v2, %s1472_s7 }
 0x1db   :  { %v1461_v3 = vpop.eup %1460 }
 0x1de   :  { %673 = vrot.lane.b32.xlu0 %v1461_v3, %s1472_s7 }
 0x24c   :  { %v672_v7 = vpop.permute.xlu0 %671 }
 0x24d   :  { %v677_v8 = vmul.f32 %v672_v7, %v667_v6 }
 0x24f   :  { %v679_v10 = vadd.f32 %v677_v8, %v655_v42  ;;  %v1455_v42 = vld [vmem:[%s1824_s3 + $0x1f4] ss:$8 sps:$4 sm:$0xff]  }
 0x250   :  { %v674_v11 = vpop.permute.xlu0 %673 }
 0x251   :  { %v678_v12 = vmul.f32 %v674_v11, %v668_v9  ;;  %1150 = vrot.lane.b32.xlu0 %v679_v10, %s1473_s14 }
 0x253   :  { %v680_v13 = vadd.f32 %v678_v12, %v658_v44  ;;  %v175_v44 = vld [vmem:[%s1825_s4 + $0x4] sm:$0xf] }
 0x254   :  { %v686_v45 = vrot.slane %v175_v44, %v181_v54  ;;  %v694_v46 = vrot.slane %v175_v44, %v189_v55  ;;  %v690_v47 = vrot.slane %v175_v44, %v185_v57  ;;  %v698_v48 = vrot.slane %v175_v44, %v193_v58 }
 0x255   :  { %v681_v16 = vpack.c.bf16 %v680_v13, %v679_v10  ;;  %1152 = vrot.lane.b32.xlu1 %v680_v13, %s1473_s14 }
 0x257   :  { %1230 = vmatmul.mubr.msk.bf16.vlgmr.msra.gmra.mrb[8].mxu0 %vm733_vm2, %v681_v16  ;;  %1232 = vmatmul.mubr.msk.bf16.vlgmr.msra.gmra.mrb[8].mxu1 %vm733_vm2, %v681_v16  ;;  %v1233_v16 = vld [vmem:[%s1825_s4 + $0x9] ss:$0 sm:$0xff] }
 0x258   :  { %1313 = vmatpush3.bf16.msra.mxu0 %v1428_v14  ;;  %1335 = vmatpush3.bf16.msra.mxu1 %v1429_v15 }
 0x259   :  { %1314 = vmatprep.subr.bf16.mxu0 %v1430_v17  ;;  %1336 = vmatprep.subr.bf16.mxu1 %v1431_v18 }
 0x25c   :  { %1315 = vmatpush3.bf16.msra.mxu0 %v1432_v19  ;;  %1337 = vmatpush3.bf16.msra.mxu1 %v1433_v20 }
 0x25d   :  { %1316 = vmatprep.subr.bf16.mxu0 %v1434_v21  ;;  %1338 = vmatprep.subr.bf16.mxu1 %v1435_v22 }
 0x260   :  { %1317 = vmatpush3.bf16.msra.mxu0 %v1436_v23  ;;  %1339 = vmatpush3.bf16.msra.mxu1 %v1437_v24 }
 0x261   :  { %1318 = vmatprep.subr.bf16.mxu0 %v1438_v25  ;;  %1340 = vmatprep.subr.bf16.mxu1 %v1439_v26 }
 0x264   :  { %1319 = vmatpush3.bf16.msra.mxu0 %v1440_v27  ;;  %1341 = vmatpush3.bf16.msra.mxu1 %v1441_v28 }
 0x265   :  { %1320 = vmatprep.subr.bf16.mxu0 %v1442_v29  ;;  %1342 = vmatprep.subr.bf16.mxu1 %v1443_v30 }
 0x268   :  { %1321 = vmatpush3.bf16.msra.mxu0 %v1444_v31  ;;  %1343 = vmatpush3.bf16.msra.mxu1 %v1445_v32 }
 0x269   :  { %1322 = vmatprep.subr.bf16.mxu0 %v1446_v33  ;;  %1344 = vmatprep.subr.bf16.mxu1 %v1447_v34 }
 0x26c   :  { %1323 = vmatpush3.bf16.msra.mxu0 %v1448_v35  ;;  %1345 = vmatpush3.bf16.msra.mxu1 %v1449_v36 }
 0x26d   :  { %1324 = vmatprep.subr.bf16.mxu0 %v1450_v37  ;;  %1346 = vmatprep.subr.bf16.mxu1 %v1451_v38  ;;  %v1143_v37 = vpop.permute.xlu1 %1142 }
 0x270   :  { %1325 = vmatpush3.bf16.msra.mxu0 %v1452_v39  ;;  %1347 = vmatpush3.bf16.msra.mxu1 %v1453_v40 }
 0x271   :  { %1326 = vmatprep.subr.bf16.mxu0 %v1454_v41  ;;  %1348 = vmatprep.subr.bf16.mxu1 %v1455_v42  ;;  %v1145_v38 = vpop.permute.xlu1 %1144 }
 0x274   :  { %1327 = vmatpush3.bf16.msra.mxu0 %v1456_v43  ;;  %1349 = vmatpush3.bf16.msra.mxu1 %v1457_v1 }
 0x2c3   :  { %v1151_v40 = vpop.permute.xlu0 %1150 }
 0x2c7   :  { %v1153_v1 = vpop.permute.xlu1 %1152 }
 0x32a   :  { %v784_v49 = vpop.f32.mrb[8].mxu0  ;;  %v827_v50 = vpop.f32.mrb[8].mxu1 }
 0x32b   :  { %v785_v51 = vadd.f32 %v784_v49, %v686_v45  ;;  %v828_v52 = vadd.f32 %v827_v50, %v694_v46  ;;  %v786_v56 = vpop.f32.mrb[9].mxu0  ;;  %v829_v59 = vpop.f32.mrb[9].mxu1 }
 0x32c   :  { %v787_v60 = vadd.f32 %v786_v56, %v690_v47  ;;  %v830_v61 = vadd.f32 %v829_v59, %v698_v48  ;;  %v788_v62 = vpop.f32.mrb[10].mxu0  ;;  %v831_v63 = vpop.f32.mrb[10].mxu1 }
 0x32d   :  { %v789_v54 = vadd.f32 %v788_v62, %v686_v45  ;;  %v832_v0 = vadd.f32 %v831_v63, %v694_v46  ;;  %v790_v2 = vpop.f32.mrb[11].mxu0  ;;  %v833_v55 = vpop.f32.mrb[11].mxu1  ;;  %v836_v57 = vmax.f32 %v785_v51, 0.0  ;;  %v838_v5 = vmax.f32 %v828_v52, 0.0 }
 0x32e   :  { %v791_v3 = vadd.f32 %v790_v2, %v690_v47  ;;  %v834_v4 = vadd.f32 %v833_v55, %v698_v48  ;;  %v837_v6 = vmax.f32 %v787_v60, 0.0  ;;  %v839_v7 = vmax.f32 %v830_v61, 0.0 }
 0x32f   :  { %v840_v53 = vmax.f32 %v789_v54, 0.0  ;;  %v842_v58 = vmax.f32 %v832_v0, 0.0 }
 0x330   :  { %v841_v8 = vmax.f32 %v791_v3, 0.0  ;;  %v843_v9 = vmax.f32 %v834_v4, 0.0 }
 0x331   :  { %v844_v10 = vpack.c.bf16 %v840_v53, %v836_v57  ;;  %v846_v11 = vpack.c.bf16 %v842_v58, %v838_v5 }
 0x332   :  { %v845_v12 = vpack.c.bf16 %v841_v8, %v837_v6  ;;  %v847_v13 = vpack.c.bf16 %v843_v9, %v839_v7 }
 0x334   :  { %1078 = vmatprep.mubr.bf16.mxu0 %v845_v12  ;;  %1119 = vmatprep.mubr.bf16.mxu1 %v847_v13 }
 0x335   :  { %1079 = vmatmul.mubr.bf16.vlgmr.msra.gmra.mrb[12].mxu0 %v844_v10  ;;  %1120 = vmatmul.mubr.bf16.vlgmr.msra.gmra.mrb[12].mxu1 %v846_v11 }
 0x408   :  { %v1328_v14 = vpop.f32.mrb[12].mxu0  ;;  %v1350_v15 = vpop.f32.mrb[12].mxu1 }
 0x409   :  { %v1329_v17 = vpop.f32.mrb[13].mxu0  ;;  %v1351_v18 = vpop.f32.mrb[13].mxu1 }
 0x40a   :  { %v1330_v19 = vadd.f32 %v1329_v17, %v1328_v14  ;;  %v1352_v20 = vadd.f32 %v1351_v18, %v1350_v15  ;;  %v1331_v21 = vpop.f32.mrb[14].mxu0  ;;  %v1353_v22 = vpop.f32.mrb[14].mxu1 }
 0x40b   :  { %v1332_v23 = vpop.f32.mrb[15].mxu0  ;;  %v1354_v24 = vpop.f32.mrb[15].mxu1 }
 0x40c   :  { %v1081_v25 = vadd.f32 %v1330_v19, %v1233_v16  ;;  %v1333_v26 = vadd.f32 %v1332_v23, %v1331_v21  ;;  %v1355_v27 = vadd.f32 %v1354_v24, %v1353_v22 }
 0x40e   :  { %v1122_v28 = vadd.f32 %v1352_v20, %v1081_v25  ;;  %v1084_v29 = vadd.f32 %v1333_v26, %v1233_v16 }
 0x410   :  { %v1266_v30 = vmul.f32 -1.442695, %v1122_v28  ;;  %v1125_v31 = vadd.f32 %v1355_v27, %v1084_v29 }
 0x412   :  { %1462 = vpow2.f32 %v1266_v30  ;;  %v1267_v32 = vmul.f32 -1.442695, %v1125_v31 }
 0x414   :  { %1464 = vpow2.f32 %v1267_v32 }
 0x41c   :  { %v1463_v33 = vpop.eup %1462 }
 0x41d   :  { %v1134_v34 = vadd.f32 1.0, %v1463_v33 }
 0x41e   :  { %v1465_v35 = vpop.eup %1464 }
 0x41f   :  { %1466 = vrcp.f32 %v1134_v34  ;;  %v1135_v36 = vadd.f32 1.0, %v1465_v35 }
 0x421   :  { %1468 = vrcp.f32 %v1135_v36 }
 0x429   :  { %v1467_v39 = vpop.eup %1466 }
 0x42a   :  { %v1156_v41 = vsel %vm279_vm0, %v1467_v39, %v1143_v37 }
 0x42b   :  { %v1469_v42 = vpop.eup %1468  ;;  %v1159_v43 = vsel %vm1158_vm3, %v1156_v41, %v1151_v40 }
 0x42c   :  { %v1162_v44 = vsel %vm1161_vm4, %v1159_v43, 0.0  ;;  %v1157_v45 = vsel %vm279_vm0, %v1469_v42, %v1145_v38 }
 0x42d   :  { %1164 = vst [vmem:[%s1827_s5] sm:$0xff] %v1162_v44  ;;  %v1160_v46 = vsel %vm1158_vm3, %v1157_v45, %v1153_v1 }
 0x42e   :  { %v1163_v47 = vsel %vm1161_vm4, %v1160_v46, 0.0 }
 0x42f   :  { %1165 = vst [vmem:[%s1827_s5 + $0x8] sm:$0xff] %v1163_v47 }

</bundles_post_ra>
